<compile_context>
chip_gen: v6e
topology: v6e:2x2x1
jax: 0.10.0
libtpu: 0.0.40
codegen_flags: <defaults>
</compile_context>

<pallas_src>
import functools

import jax
import jax.numpy as jnp
from jax.experimental import pallas as pl
from jax.experimental.pallas import tpu as pltpu


def _round_up(x, m):
    return ((x + m - 1) // m) * m


def _conv_matmul_kernel_single_k(cols_ref, w_ref, b_ref, out_ref):
    # cols_ref: (tile_m, K_pad)  bf16   im2col rows for this M tile
    # w_ref:    (K_pad, tile_n)  bf16   flattened conv weight (VMEM-resident)
    # b_ref:    (1, tile_n)      f32    bias tile
    # out_ref:  (tile_m, tile_n) x.dtype
    out_ref[...] = (
        jnp.dot(cols_ref[...], w_ref[...], preferred_element_type=jnp.float32)
        + b_ref[...]
    ).astype(out_ref.dtype)


def _conv_matmul_kernel_multi_k(cols_ref, w_ref, b_ref, out_ref, acc_ref):
    # Same as above but with K split over the last ("arbitrary") grid axis and
    # an f32 VMEM accumulator resident across it.
    k = pl.program_id(2)

    @pl.when(k == 0)
    def _():
        acc_ref[...] = jnp.zeros_like(acc_ref)

    acc_ref[...] += jnp.dot(cols_ref[...], w_ref[...],
                            preferred_element_type=jnp.float32)

    @pl.when(k == pl.num_programs(2) - 1)
    def _():
        out_ref[...] = (acc_ref[...] + b_ref[...]).astype(out_ref.dtype)


def _choose_tile_n(c_out_pad):
    if c_out_pad <= 512:
        return c_out_pad                    # whole C_out in one lane-dense tile
    for cand in (512, 256, 128):            # prefer >=256 (v6e MXU width)
        if c_out_pad % cand == 0:
            return cand
    return 128


def _choose_tile_m(m, n_cout_tiles):
    cands = (1024, 768, 512, 384, 256, 128)
    # Minimise padded M (avoid doing MXU work / DMA on zeros); tie-break larger.
    tile_m = min(cands, key=lambda c: (_round_up(m, c), -c))
    m_pad = _round_up(m, tile_m)
    # v7x megacore: make sure the parallel part of the grid has >= 2 tiles.
    if (m_pad // tile_m) * n_cout_tiles < 2 and m_pad >= 256:
        for c in cands:
            if c < tile_m and m_pad % c == 0 and m_pad // c >= 2:
                tile_m = c
                break
    return tile_m, m_pad


def conv2d_pallas(x, weight, bias, *, stride=1, padding=0):
    """Conv2d forward matching torch.nn.Conv2d(in, out, k, padding, stride)."""
    N, C_in, H, W = x.shape
    C_out, _, kH, kW = weight.shape
    H_out = (H + 2 * padding - kH) // stride + 1
    W_out = (W + 2 * padding - kW) // stride + 1
    M = N * H_out * W_out
    K = C_in * kH * kW

    # ---- glue: bf16 cast FIRST, then pad + shifted-window patches ----------
    # Casting before the kH*kW tap stack halves the dominant HBM traffic of the
    # im2col pass (the cols array is kH*kW x the activation size).
    # TODO(synk): fold the (kh, kw) taps into an in-kernel reduction over the
    # padded NHWC activation (manual windowed DMA) so the kH*kW-expanded cols
    # array is never materialized in HBM at all.
    x_bf = x.astype(jnp.bfloat16)
    x_pad = jnp.pad(x_bf, ((0, 0), (0, 0), (padding, padding), (padding, padding)))
    x_nhwc = jnp.transpose(x_pad, (0, 2, 3, 1))           # (N, Hp, Wp, C_in)
    taps = []
    for kh in range(kH):
        for kw in range(kW):
            taps.append(
                x_nhwc[:, kh:kh + (H_out - 1) * stride + 1:stride,
                          kw:kw + (W_out - 1) * stride + 1:stride, :])
    cols = jnp.stack(taps, axis=3).reshape(M, K)          # K order = (kh, kw, ci)

    # Weight flattened in matching (kh, kw, ci) order, C_out on lanes.
    w_mat = jnp.transpose(weight, (2, 3, 1, 0)).reshape(K, C_out)

    # ---- lane-dense padding + tile selection --------------------------------
    C_out_pad = _round_up(C_out, 128)
    K_pad = _round_up(K, 128)
    tile_n = _choose_tile_n(C_out_pad)
    n_cout_tiles = C_out_pad // tile_n
    tile_m, M_pad = _choose_tile_m(M, n_cout_tiles)

    single_k = K_pad <= 2048                # whole contraction fits one tile
    if single_k:
        tile_k = K_pad
    else:
        tile_k = next(c for c in (1024, 512, 256, 128) if K_pad % c == 0)

    cols = jnp.pad(cols, ((0, M_pad - M), (0, K_pad - K)))
    w_mat = jnp.pad(w_mat, ((0, K_pad - K), (0, C_out_pad - C_out))
                    ).astype(jnp.bfloat16)
    b_row = jnp.pad(bias.reshape(1, C_out),
                    ((0, 0), (0, C_out_pad - C_out))).astype(jnp.float32)

    # Explicit VMEM budget: double-buffered inputs/outputs (+ f32 accumulator).
    out_itemsize = jnp.dtype(x.dtype).itemsize
    ws = (2 * tile_m * tile_k * 2            # cols (bf16)
          + 2 * tile_k * tile_n * 2          # weight (bf16)
          + 2 * tile_n * 4                   # bias (f32)
          + 2 * tile_m * tile_n * out_itemsize)
    if not single_k:
        ws += tile_m * tile_n * 4            # accumulator scratch
    vmem_limit = int(min(max(2 * ws, 32 * 1024 * 1024), 48 * 1024 * 1024))

    grid_m = M_pad // tile_m
    if single_k:
        # cols index is constant along j (innermost) -> DMA'd once per M tile;
        # the weight/bias index is fully constant when n_cout_tiles == 1 (the
        # common case) -> the whole flattened weight stays VMEM-resident.
        grid = (grid_m, n_cout_tiles)
        in_specs = [
            pl.BlockSpec((tile_m, tile_k), lambda i, j: (i, 0)),
            pl.BlockSpec((tile_k, tile_n), lambda i, j: (0, j)),
            pl.BlockSpec((1, tile_n), lambda i, j: (0, j)),
        ]
        out_specs = pl.BlockSpec((tile_m, tile_n), lambda i, j: (i, j))
        scratch_shapes = []
        kernel = _conv_matmul_kernel_single_k
        dim_sem = ("parallel", "parallel")
    else:
        grid = (grid_m, n_cout_tiles, K_pad // tile_k)
        in_specs = [
            pl.BlockSpec((tile_m, tile_k), lambda i, j, k: (i, k)),
            pl.BlockSpec((tile_k, tile_n), lambda i, j, k: (k, j)),
            pl.BlockSpec((1, tile_n), lambda i, j, k: (0, j)),
        ]
        out_specs = pl.BlockSpec((tile_m, tile_n), lambda i, j, k: (i, j))
        scratch_shapes = [pltpu.VMEM((tile_m, tile_n), jnp.float32)]
        kernel = _conv_matmul_kernel_multi_k
        dim_sem = ("parallel", "parallel", "arbitrary")

    out_flat = pl.pallas_call(
        kernel,
        out_shape=jax.ShapeDtypeStruct((M_pad, C_out_pad), x.dtype),
        grid_spec=pltpu.PrefetchScalarGridSpec(
            num_scalar_prefetch=0,
            grid=grid,
            in_specs=in_specs,
            out_specs=out_specs,
            scratch_shapes=scratch_shapes,
        ),
        compiler_params=pltpu.CompilerParams(
            dimension_semantics=dim_sem,
            vmem_limit_bytes=vmem_limit),
    )(cols, w_mat, b_row)

    # Padded rows (M..M_pad) hold bias values; the slice removes them — keep it
    # even if the output dtype/layout changes.
    out = out_flat[:M, :C_out].reshape(N, H_out, W_out, C_out)
    return jnp.transpose(out, (0, 3, 1, 2))               # back to NCHW


def make_conv_params(key, in_channels, out_channels, kernel_size):
    """Deterministic xavier_uniform-style init for (OIHW weight, bias)."""
    kw, kb = jax.random.split(key)
    fan_in = in_channels * kernel_size * kernel_size
    fan_out = out_channels * kernel_size * kernel_size
    limit = jnp.sqrt(6.0 / (fan_in + fan_out))
    weight = jax.random.uniform(
        kw, (out_channels, in_channels, kernel_size, kernel_size),
        minval=-limit, maxval=limit, dtype=jnp.float32)
    bias = jax.random.uniform(
        kb, (out_channels,), minval=-0.01, maxval=0.01, dtype=jnp.float32)
    return weight, bias


if __name__ == "__main__":
    # Small shapes consistent with ConvModule usage (kernel_size=3, padding=1).
    N, C_in, H, W = 2, 4, 16, 16
    C_out, k, pad, stride = 8, 3, 1, 1

    key = jax.random.PRNGKey(0)
    kx, kp = jax.random.split(key)
    x = jax.random.normal(kx, (N, C_in, H, W), dtype=jnp.float32)
    weight, bias = make_conv_params(kp, C_in, C_out, k)

    conv = jax.jit(functools.partial(conv2d_pallas, stride=stride, padding=pad))
    out = conv(x, weight, bias)
    out = jax.block_until_ready(out)

    # Pure-JAX reference (same semantics as torch.nn.Conv2d forward, f32).
    ref = jax.lax.conv_general_dilated(
        x, weight, window_strides=(stride, stride),
        padding=[(pad, pad), (pad, pad)],
        dimension_numbers=("NCHW", "OIHW", "NCHW")) + bias[None, :, None, None]

    assert out.shape == ref.shape, (out.shape, ref.shape)
    max_err = float(jnp.max(jnp.abs(out - ref)))
    # bf16 MXU inputs with f32 accumulation -> loosened tolerance vs pure f32.
    assert jnp.allclose(out, ref, atol=1e-1, rtol=2e-2), max_err
    print("KERNEL_OK")
</pallas_src>

<mosaic_0001>
module attributes {stable_mosaic.version = 11 : i64} {
  func.func @_conv_matmul_kernel_single_k(%arg0: i32, %arg1: i32, %arg2: memref<256x128xbf16, #tpu.memory_space<vmem>>, %arg3: memref<128x128xbf16, #tpu.memory_space<vmem>>, %arg4: memref<1x128xf32, #tpu.memory_space<vmem>>, %arg5: memref<256x128xf32, #tpu.memory_space<vmem>>) attributes {dimension_semantics = [#tpu.dimension_semantics<parallel>, #tpu.dimension_semantics<parallel>], iteration_bounds = array<i64: 2, 1>, scalar_prefetch = 0 : i64, scratch_operands = 0 : i64, tpu.core_type = #tpu.core_type<tc>, window_params = [{transform_indices = @transform_0, window_bounds = array<i64: 256, 128>}, {transform_indices = @transform_1, window_bounds = array<i64: 128, 128>}, {transform_indices = @transform_2, window_bounds = array<i64: 1, 128>}, {transform_indices = @transform_3, window_bounds = array<i64: 256, 128>}]} {
    %c0 = arith.constant 0 : index
    %c0_0 = arith.constant 0 : index
    %0 = vector.load %arg2[%c0, %c0_0] : memref<256x128xbf16, #tpu.memory_space<vmem>>, vector<256x128xbf16>
    %c0_1 = arith.constant 0 : index
    %c0_2 = arith.constant 0 : index
    %1 = vector.load %arg3[%c0_1, %c0_2] : memref<128x128xbf16, #tpu.memory_space<vmem>>, vector<128x128xbf16>
    %cst = arith.constant dense<0.000000e+00> : vector<256x128xf32>
    %2 = tpu.matmul %0, %1, %cst {dimension_numbers = #tpu.dot_dimension_numbers<[1], [0], [0], [1], [0, 0, 1, 1], [], []>} : vector<256x128xbf16>, vector<128x128xbf16>, vector<256x128xf32> -> vector<256x128xf32>
    %c0_3 = arith.constant 0 : index
    %c0_4 = arith.constant 0 : index
    %3 = vector.load %arg4[%c0_3, %c0_4] : memref<1x128xf32, #tpu.memory_space<vmem>>, vector<1x128xf32>
    %4 = vector.broadcast %3 : vector<1x128xf32> to vector<256x128xf32>
    %5 = arith.addf %2, %4 : vector<256x128xf32>
    %c0_5 = arith.constant 0 : index
    %c0_6 = arith.constant 0 : index
    %6 = vector.load %arg5[%c0_5, %c0_6] : memref<256x128xf32, #tpu.memory_space<vmem>>, vector<256x128xf32>
    tpu.vector_store %arg5[%c0_5, %c0_6], %5 {strides = array<i32>} : memref<256x128xf32, #tpu.memory_space<vmem>>, vector<256x128xf32>,
    return
  }
  func.func @transform_0(%arg0: i32, %arg1: i32) -> (i32, i32) {
    %c0_i32 = arith.constant 0 : i32
    %c0_i32_0 = arith.constant 0 : i32
    return %arg0, %c0_i32 : i32, i32
  }
  func.func @transform_1(%arg0: i32, %arg1: i32) -> (i32, i32) {
    %c0_i32 = arith.constant 0 : i32
    %c0_i32_0 = arith.constant 0 : i32
    return %c0_i32, %arg1 : i32, i32
  }
  func.func @transform_2(%arg0: i32, %arg1: i32) -> (i32, i32) {
    %c0_i32 = arith.constant 0 : i32
    %c0_i32_0 = arith.constant 0 : i32
    return %c0_i32, %arg1 : i32, i32
  }
  func.func @transform_3(%arg0: i32, %arg1: i32) -> (i32, i32) {
    %c0_i32 = arith.constant 0 : i32
    return %arg0, %arg1 : i32, i32
  }
}

</mosaic_0001>

<bundles_post_ra>
// kernel: conv2d_pallas.1
= control target key start
LH: loop header
LB: loop body
LE: loop exit
PB: predicated region body
PF: predicated region fallthrough
CT: control target
= control target key end

     0   :  { %s938_s12 = smov 0   ;;  %s940_s13 = smov 0   ;;  %s1088_s0 = inlined_call_operand.vmem [shape: bf16[512,128], index: 0, kind: input, shape index: {}]   ;;  %s1089_s1 = inlined_call_operand.vmem [shape: bf16[128,128], index: 1, kind: input, shape index: {}]   ;;  %s1090_s2 = inlined_call_operand.vmem [shape: f32[1,128], index: 2, kind: input, shape index: {}]   ;;  %s1091_s3 = inlined_call_operand.vmem [shape: f32[512,128], index: 3, kind: output, shape index: {}]  }
   0x1   :  { %s942_s14 = smov 0  }
   0x2 LB: > { %s25_s15 = sadd.s32 1, %s912_s13  ;;  %p726_p0 = scmp.ge.s32.totalorder %s916_s14, 1  ;;  %s916_s14 = sphi %s942_s14, %s13_s14   ;;  %s912_s13 = sphi %s940_s13, %s1093_s13   ;;  %s908_s12 = sphi %s938_s12, %s1092_s12  }
   0x3   : > { %p27_p1 = scmp.ge.s32.totalorder %s25_s15, 2  ;;  %p169_p2 = scmp.lt.s32.totalorder %s916_s14, 3 }
   0x5   : > { %s1095_s15 = smov (%p27_p1, %s25_s15), 0  ;;  %p170_p3 = pnand %p726_p0, %p169_p2 }
   0x6   : > { %s727_s18 = sshll.u32 (!%p170_p3), %s908_s12, 5 }
   0x7   : > { %173 = sbr.rel (%p170_p3) target bundleno = 271 (0x10f), region = 32  ;;  %p204_p4 = scmp.lt.s32.totalorder (!%p170_p3), %s727_s18, 63 }
   0xc   : > { %v870_v0 = vld [vmem:[%s1089_s1 + $0x38] sm:$0xff]   ;;  %v871_v1 = vld [vmem:[%s1089_s1 + $0x30] sm:$0xff]   ;;  %s1097_s18 = smov (!%p204_p4, %s727_s18), 63  ;;  %v872_v2 = vld [vmem:[%s1089_s1 + $0x28] sm:$0xff]  }
   0xd   : > { %782 = vmatprep.subr.bf16.mxu0 %v870_v0  ;;  %830 = vmatprep.subr.bf16.mxu1 %v870_v0  ;;  %s728_s23 = sshll.u32 %s1097_s18, 2  ;;  %v873_v3 = vld [vmem:[%s1089_s1 + $0x20] sm:$0xff]   ;;  %v874_v6 = vld [vmem:[%s1089_s1 + $0x18] sm:$0xff]   ;;  %v875_v7 = vld [vmem:[%s1089_s1 + $0x10] sm:$0xff]   ;;  %s730_s10 = sshll.u32 %s1097_s18, 3 }
   0xe   : > { %783 = vmatpush3.bf16.msra.mxu0 %v870_v0  ;;  %838 = vmatpush3.bf16.msra.mxu1 %v870_v0  ;;  %s971_s26 = scalar_lea.vmem %s1088_s0, %s728_s23  ;;  %v876_v8 = vld [vmem:[%s1089_s1 + $0x8] sm:$0xff]   ;;  %v877_v9 = vld [vmem:[%s1089_s1] sm:$0xff]   ;;  %s1013_s19 = scalar_lea.vmem %s1091_s3, %s730_s10 }
   0xf   : > { %784 = vmatprep.subr.bf16.mxu0 %v871_v1  ;;  %831 = vmatprep.subr.bf16.mxu1 %v871_v1  ;;  %v878_v4 = vld [vmem:[%s971_s26] sm:$0xff]   ;;  %v880_v10 = vld [vmem:[%s971_s26 + $0x8] sm:$0xff]   ;;  %v882_v12 = vld [vmem:[%s971_s26 + $0x10] sm:$0xff]  }
  0x10   : > { %v879_v5 = vld [vmem:[%s971_s26 + $0x40] sm:$0xff]   ;;  %798 = vmatprep.mubr.bf16.mxu0 %v878_v4  ;;  %v881_v11 = vld [vmem:[%s971_s26 + $0x48] sm:$0xff]   ;;  %v883_v13 = vld [vmem:[%s971_s26 + $0x50] sm:$0xff]  }
  0x11   : > { %814 = vmatprep.mubr.bf16.mxu1 %v879_v5  ;;  %v884_v14 = vld [vmem:[%s971_s26 + $0x18] sm:$0xff]   ;;  %v886_v16 = vld [vmem:[%s971_s26 + $0x20] sm:$0xff]   ;;  %v888_v18 = vld [vmem:[%s971_s26 + $0x28] sm:$0xff]  }
  0x12   : > { %785 = vmatpush3.bf16.msra.mxu0 %v871_v1  ;;  %839 = vmatpush3.bf16.msra.mxu1 %v871_v1  ;;  %v885_v15 = vld [vmem:[%s971_s26 + $0x58] sm:$0xff]   ;;  %v887_v17 = vld [vmem:[%s971_s26 + $0x60] sm:$0xff]   ;;  %v889_v19 = vld [vmem:[%s971_s26 + $0x68] sm:$0xff]  }
  0x13   : > { %786 = vmatprep.subr.bf16.mxu0 %v872_v2  ;;  %832 = vmatprep.subr.bf16.mxu1 %v872_v2  ;;  %v890_v20 = vld [vmem:[%s971_s26 + $0x30] sm:$0xff]   ;;  %v892_v22 = vld [vmem:[%s971_s26 + $0x38] sm:$0xff]   ;;  %v1008_v24 = vld [vmem:[%s1090_s2] ss:$0 sm:$0xff] }
  0x14   : > { %v891_v21 = vld [vmem:[%s971_s26 + $0x70] sm:$0xff]   ;;  %v893_v23 = vld [vmem:[%s971_s26 + $0x78] sm:$0xff]  }
  0x16   : > { %787 = vmatpush3.bf16.msra.mxu0 %v872_v2  ;;  %840 = vmatpush3.bf16.msra.mxu1 %v872_v2 }
  0x17   : > { %788 = vmatprep.subr.bf16.mxu0 %v873_v3  ;;  %833 = vmatprep.subr.bf16.mxu1 %v873_v3 }
  0x1a   : > { %789 = vmatpush3.bf16.msra.mxu0 %v873_v3  ;;  %841 = vmatpush3.bf16.msra.mxu1 %v873_v3 }
  0x1b   : > { %790 = vmatprep.subr.bf16.mxu0 %v874_v6  ;;  %834 = vmatprep.subr.bf16.mxu1 %v874_v6 }
  0x1e   : > { %791 = vmatpush3.bf16.msra.mxu0 %v874_v6  ;;  %842 = vmatpush3.bf16.msra.mxu1 %v874_v6 }
  0x1f   : > { %792 = vmatprep.subr.bf16.mxu0 %v875_v7  ;;  %835 = vmatprep.subr.bf16.mxu1 %v875_v7 }
  0x22   : > { %793 = vmatpush3.bf16.msra.mxu0 %v875_v7  ;;  %843 = vmatpush3.bf16.msra.mxu1 %v875_v7 }
  0x23   : > { %794 = vmatprep.subr.bf16.mxu0 %v876_v8  ;;  %836 = vmatprep.subr.bf16.mxu1 %v876_v8 }
  0x26   : > { %795 = vmatpush3.bf16.msra.mxu0 %v876_v8  ;;  %844 = vmatpush3.bf16.msra.mxu1 %v876_v8 }
  0x27   : > { %796 = vmatprep.subr.bf16.mxu0 %v877_v9  ;;  %837 = vmatprep.subr.bf16.mxu1 %v877_v9 }
  0x2a   : > { %797 = vmatpush3.bf16.msra.mxu0 %v877_v9  ;;  %845 = vmatpush3.bf16.msra.mxu1 %v877_v9 }
  0x2d   : > { %799 = vmatmul.mubr.bf16.vlgmr.msra.gmra.mxu0 %v880_v10  ;;  %815 = vmatmul.mubr.bf16.vlgmr.msra.gmra.mxu1 %v881_v11 }
  0x2e   : > { %802 = vmatprep.mubr.bf16.mxu0 %v882_v12  ;;  %818 = vmatprep.mubr.bf16.mxu1 %v883_v13 }
  0x35   : > { %803 = vmatmul.mubr.bf16.gmra.mxu0 %v884_v14  ;;  %819 = vmatmul.mubr.bf16.gmra.mxu1 %v885_v15 }
  0x36   : > { %806 = vmatprep.mubr.bf16.mxu0 %v886_v16  ;;  %822 = vmatprep.mubr.bf16.mxu1 %v887_v17 }
  0x3d   : > { %807 = vmatmul.mubr.bf16.gmra.mxu0 %v888_v18  ;;  %823 = vmatmul.mubr.bf16.gmra.mxu1 %v889_v19 }
  0x3e   : > { %810 = vmatprep.mubr.bf16.mxu0 %v890_v20  ;;  %826 = vmatprep.mubr.bf16.mxu1 %v891_v21 }
  0x45   : > { %811 = vmatmul.mubr.bf16.gmra.mxu0 %v892_v22  ;;  %827 = vmatmul.mubr.bf16.gmra.mxu1 %v893_v23 }
  0xed   : > { %v800_v25 = vpop.f32.mrf.mxu0  ;;  %v816_v26 = vpop.f32.mrf.mxu1 }
  0xee   : > { %v468_v27 = vadd.f32 %v800_v25, %v1008_v24  ;;  %v532_v28 = vadd.f32 %v816_v26, %v1008_v24 }
  0xef   : > { %v459_v29 = vpop.f32.mrf.mxu0  ;;  %v523_v30 = vpop.f32.mrf.mxu1 }
  0xf0   : > { %588 = vst [vmem:[%s1013_s19 + $0x10] sm:$0xff] %v468_v27  ;;  %604 = vst [vmem:[%s1013_s19 + $0x90] sm:$0xff] %v532_v28  ;;  %v460_v31 = vadd.f32 %v1008_v24, %v459_v29  ;;  %v524_v32 = vadd.f32 %v1008_v24, %v523_v30 }
  0xf1   : > { %v801_v33 = vpop.f32.mrf.mxu0  ;;  %v817_v34 = vpop.f32.mrf.mxu1 }
  0xf2   : > { %586 = vst [vmem:[%s1013_s19] sm:$0xff] %v460_v31  ;;  %602 = vst [vmem:[%s1013_s19 + $0x80] sm:$0xff] %v524_v32  ;;  %v471_v35 = vadd.f32 %v801_v33, %v1008_v24  ;;  %v535_v36 = vadd.f32 %v817_v34, %v1008_v24 }
  0xf3   : > { %v462_v37 = vpop.f32.mrf.mxu0  ;;  %v526_v38 = vpop.f32.mrf.mxu1 }
  0xf4   : > { %589 = vst [vmem:[%s1013_s19 + $0x18] sm:$0xff] %v471_v35  ;;  %605 = vst [vmem:[%s1013_s19 + $0x98] sm:$0xff] %v535_v36  ;;  %v463_v39 = vadd.f32 %v1008_v24, %v462_v37  ;;  %v527_v40 = vadd.f32 %v1008_v24, %v526_v38 }
  0xf5   : > { %v804_v41 = vpop.f32.mrf.mxu0  ;;  %v820_v42 = vpop.f32.mrf.mxu1 }
  0xf6   : > { %587 = vst [vmem:[%s1013_s19 + $0x8] sm:$0xff] %v463_v39  ;;  %603 = vst [vmem:[%s1013_s19 + $0x88] sm:$0xff] %v527_v40  ;;  %v484_v43 = vadd.f32 %v804_v41, %v1008_v24  ;;  %v548_v44 = vadd.f32 %v820_v42, %v1008_v24 }
  0xf7   : > { %v475_v45 = vpop.f32.mrf.mxu0  ;;  %v539_v46 = vpop.f32.mrf.mxu1 }
  0xf8   : > { %592 = vst [vmem:[%s1013_s19 + $0x30] sm:$0xff] %v484_v43  ;;  %608 = vst [vmem:[%s1013_s19 + $0xb0] sm:$0xff] %v548_v44  ;;  %v476_v47 = vadd.f32 %v1008_v24, %v475_v45  ;;  %v540_v48 = vadd.f32 %v1008_v24, %v539_v46 }
  0xf9   : > { %v805_v49 = vpop.f32.mrf.mxu0  ;;  %v821_v50 = vpop.f32.mrf.mxu1 }
  0xfa   : > { %590 = vst [vmem:[%s1013_s19 + $0x20] sm:$0xff] %v476_v47  ;;  %606 = vst [vmem:[%s1013_s19 + $0xa0] sm:$0xff] %v540_v48  ;;  %v487_v51 = vadd.f32 %v805_v49, %v1008_v24  ;;  %v551_v52 = vadd.f32 %v821_v50, %v1008_v24 }
  0xfb   : > { %v478_v53 = vpop.f32.mrf.mxu0  ;;  %v542_v54 = vpop.f32.mrf.mxu1 }
  0xfc   : > { %593 = vst [vmem:[%s1013_s19 + $0x38] sm:$0xff] %v487_v51  ;;  %609 = vst [vmem:[%s1013_s19 + $0xb8] sm:$0xff] %v551_v52  ;;  %v479_v55 = vadd.f32 %v1008_v24, %v478_v53  ;;  %v543_v56 = vadd.f32 %v1008_v24, %v542_v54 }
  0xfd   : > { %v808_v57 = vpop.f32.mrf.mxu0  ;;  %v824_v58 = vpop.f32.mrf.mxu1 }
  0xfe   : > { %591 = vst [vmem:[%s1013_s19 + $0x28] sm:$0xff] %v479_v55  ;;  %607 = vst [vmem:[%s1013_s19 + $0xa8] sm:$0xff] %v543_v56  ;;  %v500_v59 = vadd.f32 %v808_v57, %v1008_v24  ;;  %v564_v60 = vadd.f32 %v824_v58, %v1008_v24 }
  0xff   : > { %v491_v61 = vpop.f32.mrf.mxu0  ;;  %v555_v62 = vpop.f32.mrf.mxu1 }
 0x100   : > { %596 = vst [vmem:[%s1013_s19 + $0x50] sm:$0xff] %v500_v59  ;;  %612 = vst [vmem:[%s1013_s19 + $0xd0] sm:$0xff] %v564_v60  ;;  %v492_v63 = vadd.f32 %v1008_v24, %v491_v61  ;;  %v556_v0 = vadd.f32 %v1008_v24, %v555_v62 }
 0x101   : > { %v809_v1 = vpop.f32.mrf.mxu0  ;;  %v825_v2 = vpop.f32.mrf.mxu1 }
 0x102   : > { %594 = vst [vmem:[%s1013_s19 + $0x40] sm:$0xff] %v492_v63  ;;  %610 = vst [vmem:[%s1013_s19 + $0xc0] sm:$0xff] %v556_v0  ;;  %v503_v3 = vadd.f32 %v809_v1, %v1008_v24  ;;  %v567_v4 = vadd.f32 %v825_v2, %v1008_v24 }
 0x103   : > { %v494_v5 = vpop.f32.mrf.mxu0  ;;  %v558_v6 = vpop.f32.mrf.mxu1 }
 0x104   : > { %597 = vst [vmem:[%s1013_s19 + $0x58] sm:$0xff] %v503_v3  ;;  %613 = vst [vmem:[%s1013_s19 + $0xd8] sm:$0xff] %v567_v4  ;;  %v495_v7 = vadd.f32 %v1008_v24, %v494_v5  ;;  %v559_v8 = vadd.f32 %v1008_v24, %v558_v6 }
 0x105   : > { %v812_v9 = vpop.f32.mrf.mxu0  ;;  %v828_v10 = vpop.f32.mrf.mxu1 }
 0x106   : > { %595 = vst [vmem:[%s1013_s19 + $0x48] sm:$0xff] %v495_v7  ;;  %611 = vst [vmem:[%s1013_s19 + $0xc8] sm:$0xff] %v559_v8  ;;  %v516_v11 = vadd.f32 %v812_v9, %v1008_v24  ;;  %v580_v12 = vadd.f32 %v828_v10, %v1008_v24 }
 0x107   : > { %v507_v13 = vpop.f32.mrf.mxu0  ;;  %v571_v14 = vpop.f32.mrf.mxu1 }
 0x108   : > { %600 = vst [vmem:[%s1013_s19 + $0x70] sm:$0xff] %v516_v11  ;;  %616 = vst [vmem:[%s1013_s19 + $0xf0] sm:$0xff] %v580_v12  ;;  %v508_v15 = vadd.f32 %v1008_v24, %v507_v13  ;;  %v572_v16 = vadd.f32 %v1008_v24, %v571_v14 }
 0x109   : > { %v813_v17 = vpop.f32.mrf.mxu0  ;;  %v829_v18 = vpop.f32.mrf.mxu1 }
 0x10a   : > { %598 = vst [vmem:[%s1013_s19 + $0x60] sm:$0xff] %v508_v15  ;;  %614 = vst [vmem:[%s1013_s19 + $0xe0] sm:$0xff] %v572_v16  ;;  %v519_v19 = vadd.f32 %v813_v17, %v1008_v24  ;;  %v583_v20 = vadd.f32 %v829_v18, %v1008_v24 }
 0x10b   : > { %v510_v21 = vpop.f32.mrf.mxu0  ;;  %v574_v22 = vpop.f32.mrf.mxu1 }
 0x10c   : > { %601 = vst [vmem:[%s1013_s19 + $0x78] sm:$0xff] %v519_v19  ;;  %617 = vst [vmem:[%s1013_s19 + $0xf8] sm:$0xff] %v583_v20  ;;  %v511_v23 = vadd.f32 %v1008_v24, %v510_v21  ;;  %v575_v25 = vadd.f32 %v1008_v24, %v574_v22 }
 0x10e   : > { %599 = vst [vmem:[%s1013_s19 + $0x68] sm:$0xff] %v511_v23  ;;  %615 = vst [vmem:[%s1013_s19 + $0xe8] sm:$0xff] %v575_v25 }
 0x10f PF: > { %s13_s14 = sadd.s32 1, %s916_s14   ;;  %s1092_s12 = smov %s912_s13 }
 0x110   : > { %p10_p5 = scmp.ge.s32.totalorder %s13_s14, 4   ;;  %s1093_s13 = smov %s1095_s15 }
 0x112   :  { %12 = sbr.rel (!%p10_p5) target bundleno = 2 (0x2), region = 68 }

</bundles_post_ra>
